<compile_context>
chip_gen: v7x
topology: tpu7x:2x2x1
jax: 0.10.0
libtpu: 0.0.40
codegen_flags: <defaults>
</compile_context>

<pallas_src>
import functools

import jax
import jax.numpy as jnp
from jax import lax
from jax.experimental import pallas as pl
from jax.experimental.pallas import tpu as pltpu

LANE = 128                      # vreg lane width
MAX_TM = 8192                   # rows per block: (8192, 128) f32 = 4 MiB / input block
VMEM_LIMIT_BYTES = 40 * 1024 * 1024


def _cdiv(a, b):
    return -(-a // b)


def _ss_loss_kernel(x_ref, t_ref, d2t_ref, d2_ref, tsum_ref, *,
                    n_valid, tm, needs_mask):
    i = pl.program_id(0)

    @pl.when(i == 0)
    def _init():
        d2t_ref[...] = jnp.zeros_like(d2t_ref)
        d2_ref[...] = jnp.zeros_like(d2_ref)
        tsum_ref[...] = jnp.zeros_like(tsum_ref)

    x = x_ref[...].astype(jnp.float32)
    t = t_ref[...].astype(jnp.float32)
    # sigmoid(x) == 0.5 * tanh(0.5 * x) + 0.5  (single EUP op per element).
    p = 0.5 * jnp.tanh(0.5 * x) + 0.5
    d = p - t
    d2 = d * d

    def _fold(v):
        # (tm, LANE) -> (8, LANE) partial sums.  Pure VALU tree-add when the
        # row count is a multiple of 8 (always true for the big-block path).
        r = v.shape[0]
        if r % 8 == 0:
            return jnp.sum(v.reshape(r // 8, 8, LANE), axis=0)
        # Tiny single-block fallback (rows < 8 or not a multiple of 8).
        s = jnp.sum(v, axis=0, keepdims=True)                      # (1, LANE)
        row = lax.broadcasted_iota(jnp.int32, (8, LANE), 0)
        return jnp.where(row == 0, jnp.broadcast_to(s, (8, LANE)), 0.0)

    def _accumulate(d2v, tv):
        d2t_ref[...] += _fold(d2v * tv)
        d2_ref[...] += _fold(d2v)
        tsum_ref[...] += _fold(tv)

    if needs_mask:
        # Only the last grid step can contain elements past the valid count
        # (lane padding and/or rows of the partial edge block).
        is_last = i == pl.num_programs(0) - 1

        @pl.when(jnp.logical_not(is_last))
        def _full():
            _accumulate(d2, t)

        @pl.when(is_last)
        def _masked():
            row = lax.broadcasted_iota(jnp.int32, d2.shape, 0)
            col = lax.broadcasted_iota(jnp.int32, d2.shape, 1)
            gidx = (i * tm + row) * LANE + col
            mask = gidx < n_valid
            _accumulate(jnp.where(mask, d2, 0.0), jnp.where(mask, t, 0.0))
    else:
        _accumulate(d2, t)


def sensitivity_specificity_loss(inputs, targets, alpha_sen=0.5):
    """Pallas TPU implementation of Sensitivity_SpecificityLoss.forward."""
    x = inputs.reshape(-1)
    t = targets.reshape(-1)
    n = x.shape[0]

    rows = _cdiv(n, LANE)
    lane_pad = rows * LANE - n
    if lane_pad:
        # TODO(synk): this small pad (<128 elems) still costs an HBM copy of
        # each input; only taken when numel is not a multiple of 128.
        x = jnp.pad(x, (0, lane_pad))
        t = jnp.pad(t, (0, lane_pad))
    x2 = x.reshape(rows, LANE)
    t2 = t.reshape(rows, LANE)

    # Single block when everything fits; otherwise big 8-aligned blocks with
    # the partial edge block masked in-kernel.
    tm = rows if rows <= MAX_TM else MAX_TM
    num_blocks = _cdiv(rows, tm)
    needs_mask = num_blocks * tm * LANE > n

    kernel = functools.partial(
        _ss_loss_kernel, n_valid=n, tm=tm, needs_mask=needs_mask)

    acc_shape = jax.ShapeDtypeStruct((8, LANE), jnp.float32)
    in_map = lambda i: (i, 0)
    out_map = lambda i: (0, 0)

    out_d2t, out_d2, out_t = pl.pallas_call(
        kernel,
        out_shape=(acc_shape, acc_shape, acc_shape),
        grid_spec=pltpu.PrefetchScalarGridSpec(
            num_scalar_prefetch=0,
            grid=(num_blocks,),
            in_specs=[
                pl.BlockSpec((tm, LANE), in_map),
                pl.BlockSpec((tm, LANE), in_map),
            ],
            out_specs=(
                pl.BlockSpec((8, LANE), out_map),
                pl.BlockSpec((8, LANE), out_map),
                pl.BlockSpec((8, LANE), out_map),
            ),
        ),
        compiler_params=pltpu.CompilerParams(
            dimension_semantics=("arbitrary",),
            vmem_limit_bytes=VMEM_LIMIT_BYTES,
        ),
    )(x2, t2)

    # --- finalize in plain JAX (tiny: 3 x (8, 128) arrays) ---
    s_d2t = jnp.sum(out_d2t)             # sum((p - t)^2 * t)
    s_d2 = jnp.sum(out_d2)               # sum((p - t)^2)   (valid elements only)
    s_t = jnp.sum(out_t)                 # sum(t)

    smooth = 1e-05
    s_d2_1mt = s_d2 - s_d2t              # sum((p - t)^2 * (1 - t))
    s_1mt = jnp.float32(n) - s_t         # sum(1 - t)

    sensitivity_loss = s_d2t / (s_t + smooth)
    specificity_loss = s_d2_1mt / (s_1mt + smooth)
    return alpha_sen * sensitivity_loss + (1.0 - alpha_sen) * specificity_loss


def _reference(inputs, targets, alpha_sen=0.5):
    p = jax.nn.sigmoid(inputs.astype(jnp.float32))
    t = targets.astype(jnp.float32)
    smooth = 1e-05
    d2 = (p - t) ** 2
    sen = jnp.sum(d2 * t) / (jnp.sum(t) + smooth)
    spec = jnp.sum(d2 * (1.0 - t)) / (jnp.sum(1.0 - t) + smooth)
    return alpha_sen * sen + (1.0 - alpha_sen) * spec


if __name__ == "__main__":
    key = jax.random.PRNGKey(0)
    k1, k2, k3, k4 = jax.random.split(key, 4)

    # NCHW, like the PyTorch segmentation-logit / binary-mask inputs.
    B, C, H, W = 2, 4, 16, 16
    inputs = jax.random.normal(k1, (B, C, H, W), dtype=jnp.float32)
    targets = (jax.random.uniform(k2, (B, C, H, W)) > 0.5).astype(jnp.float32)

    loss = jax.block_until_ready(
        sensitivity_specificity_loss(inputs, targets, alpha_sen=0.5))
    ref = _reference(inputs, targets, alpha_sen=0.5)
    assert jnp.allclose(loss, ref, rtol=2e-5, atol=1e-6), (loss, ref)

    # Ragged size (numel not a multiple of 128): exercises the in-kernel mask.
    shape2 = (2, 3, 7, 11)
    inputs2 = jax.random.normal(k3, shape2, dtype=jnp.float32)
    targets2 = (jax.random.uniform(k4, shape2) > 0.5).astype(jnp.float32)
    loss2 = jax.block_until_ready(
        sensitivity_specificity_loss(inputs2, targets2, alpha_sen=0.3))
    ref2 = _reference(inputs2, targets2, alpha_sen=0.3)
    assert jnp.allclose(loss2, ref2, rtol=2e-5, atol=1e-6), (loss2, ref2)

    print("KERNEL_OK")
</pallas_src>

<mosaic_0001>
module attributes {stable_mosaic.version = 11 : i64} {
  func.func @_ss_loss_kernel(%arg0: i32, %arg1: memref<16x128xf32, #tpu.memory_space<vmem>>, %arg2: memref<16x128xf32, #tpu.memory_space<vmem>>, %arg3: memref<8x128xf32, #tpu.memory_space<vmem>>, %arg4: memref<8x128xf32, #tpu.memory_space<vmem>>, %arg5: memref<8x128xf32, #tpu.memory_space<vmem>>) attributes {dimension_semantics = [#tpu.dimension_semantics<arbitrary>], iteration_bounds = array<i64: 1>, scalar_prefetch = 0 : i64, scratch_operands = 0 : i64, tpu.core_type = #tpu.core_type<tc>, window_params = [{transform_indices = @transform_0, window_bounds = array<i64: 16, 128>}, {transform_indices = @transform_1, window_bounds = array<i64: 16, 128>}, {pipeline_mode = #tpu.pipeline_mode<synchronous>, transform_indices = @transform_2, window_bounds = array<i64: 8, 128>}, {pipeline_mode = #tpu.pipeline_mode<synchronous>, transform_indices = @transform_3, window_bounds = array<i64: 8, 128>}, {pipeline_mode = #tpu.pipeline_mode<synchronous>, transform_indices = @transform_4, window_bounds = array<i64: 8, 128>}]} {
    %c0_i32 = arith.constant 0 : i32
    %0 = arith.cmpi eq, %arg0, %c0_i32 : i32
    %1 = arith.extui %0 : i1 to i32
    %c0_i32_0 = arith.constant 0 : i32
    %2 = arith.cmpi ne, %1, %c0_i32_0 : i32
    scf.if %2 {
      %cst_21 = arith.constant 0.000000e+00 : f32
      %30 = vector.broadcast %cst_21 : f32 to vector<8x128xf32>
      %c0_22 = arith.constant 0 : index
      %c0_23 = arith.constant 0 : index
      %31 = vector.load %arg3[%c0_22, %c0_23] : memref<8x128xf32, #tpu.memory_space<vmem>>, vector<8x128xf32>
      tpu.vector_store %arg3[%c0_22, %c0_23], %30 {strides = array<i32>} : memref<8x128xf32, #tpu.memory_space<vmem>>, vector<8x128xf32>,
      %cst_24 = arith.constant 0.000000e+00 : f32
      %32 = vector.broadcast %cst_24 : f32 to vector<8x128xf32>
      %c0_25 = arith.constant 0 : index
      %c0_26 = arith.constant 0 : index
      %33 = vector.load %arg4[%c0_25, %c0_26] : memref<8x128xf32, #tpu.memory_space<vmem>>, vector<8x128xf32>
      tpu.vector_store %arg4[%c0_25, %c0_26], %32 {strides = array<i32>} : memref<8x128xf32, #tpu.memory_space<vmem>>, vector<8x128xf32>,
      %cst_27 = arith.constant 0.000000e+00 : f32
      %34 = vector.broadcast %cst_27 : f32 to vector<8x128xf32>
      %c0_28 = arith.constant 0 : index
      %c0_29 = arith.constant 0 : index
      %35 = vector.load %arg5[%c0_28, %c0_29] : memref<8x128xf32, #tpu.memory_space<vmem>>, vector<8x128xf32>
      tpu.vector_store %arg5[%c0_28, %c0_29], %34 {strides = array<i32>} : memref<8x128xf32, #tpu.memory_space<vmem>>, vector<8x128xf32>,
    } else {
    }
    %c0 = arith.constant 0 : index
    %c0_1 = arith.constant 0 : index
    %3 = vector.load %arg1[%c0, %c0_1] : memref<16x128xf32, #tpu.memory_space<vmem>>, vector<16x128xf32>
    %c0_2 = arith.constant 0 : index
    %c0_3 = arith.constant 0 : index
    %4 = vector.load %arg2[%c0_2, %c0_3] : memref<16x128xf32, #tpu.memory_space<vmem>>, vector<16x128xf32>
    %cst = arith.constant 5.000000e-01 : f32
    %5 = vector.broadcast %cst : f32 to vector<16x128xf32>
    %6 = arith.mulf %5, %3 : vector<16x128xf32>
    %7 = math.tanh %6 : vector<16x128xf32>
    %cst_4 = arith.constant 5.000000e-01 : f32
    %8 = vector.broadcast %cst_4 : f32 to vector<16x128xf32>
    %9 = arith.mulf %8, %7 : vector<16x128xf32>
    %cst_5 = arith.constant 5.000000e-01 : f32
    %10 = vector.broadcast %cst_5 : f32 to vector<16x128xf32>
    %11 = arith.addf %9, %10 : vector<16x128xf32>
    %12 = arith.subf %11, %4 : vector<16x128xf32>
    %13 = arith.mulf %12, %12 : vector<16x128xf32>
    %c0_6 = arith.constant 0 : index
    %c0_7 = arith.constant 0 : index
    %14 = vector.load %arg3[%c0_6, %c0_7] : memref<8x128xf32, #tpu.memory_space<vmem>>, vector<8x128xf32>
    %15 = arith.mulf %13, %4 : vector<16x128xf32>
    %16 = vector.shape_cast %15 : vector<16x128xf32> to vector<2x8x128xf32>
    %cst_8 = arith.constant dense<0.000000e+00> : vector<8x128xf32>
    %17 = vector.multi_reduction <add>, %16, %cst_8 [0] : vector<2x8x128xf32> to vector<8x128xf32>
    %18 = arith.addf %14, %17 : vector<8x128xf32>
    %c0_9 = arith.constant 0 : index
    %c0_10 = arith.constant 0 : index
    %19 = vector.load %arg3[%c0_9, %c0_10] : memref<8x128xf32, #tpu.memory_space<vmem>>, vector<8x128xf32>
    tpu.vector_store %arg3[%c0_9, %c0_10], %18 {strides = array<i32>} : memref<8x128xf32, #tpu.memory_space<vmem>>, vector<8x128xf32>,
    %c0_11 = arith.constant 0 : index
    %c0_12 = arith.constant 0 : index
    %20 = vector.load %arg4[%c0_11, %c0_12] : memref<8x128xf32, #tpu.memory_space<vmem>>, vector<8x128xf32>
    %21 = vector.shape_cast %13 : vector<16x128xf32> to vector<2x8x128xf32>
    %cst_13 = arith.constant dense<0.000000e+00> : vector<8x128xf32>
    %22 = vector.multi_reduction <add>, %21, %cst_13 [0] : vector<2x8x128xf32> to vector<8x128xf32>
    %23 = arith.addf %20, %22 : vector<8x128xf32>
    %c0_14 = arith.constant 0 : index
    %c0_15 = arith.constant 0 : index
    %24 = vector.load %arg4[%c0_14, %c0_15] : memref<8x128xf32, #tpu.memory_space<vmem>>, vector<8x128xf32>
    tpu.vector_store %arg4[%c0_14, %c0_15], %23 {strides = array<i32>} : memref<8x128xf32, #tpu.memory_space<vmem>>, vector<8x128xf32>,
    %c0_16 = arith.constant 0 : index
    %c0_17 = arith.constant 0 : index
    %25 = vector.load %arg5[%c0_16, %c0_17] : memref<8x128xf32, #tpu.memory_space<vmem>>, vector<8x128xf32>
    %26 = vector.shape_cast %4 : vector<16x128xf32> to vector<2x8x128xf32>
    %cst_18 = arith.constant dense<0.000000e+00> : vector<8x128xf32>
    %27 = vector.multi_reduction <add>, %26, %cst_18 [0] : vector<2x8x128xf32> to vector<8x128xf32>
    %28 = arith.addf %25, %27 : vector<8x128xf32>
    %c0_19 = arith.constant 0 : index
    %c0_20 = arith.constant 0 : index
    %29 = vector.load %arg5[%c0_19, %c0_20] : memref<8x128xf32, #tpu.memory_space<vmem>>, vector<8x128xf32>
    tpu.vector_store %arg5[%c0_19, %c0_20], %28 {strides = array<i32>} : memref<8x128xf32, #tpu.memory_space<vmem>>, vector<8x128xf32>,
    return
  }
  func.func @transform_0(%arg0: i32) -> (i32, i32) {
    %c0_i32 = arith.constant 0 : i32
    %c0_i32_0 = arith.constant 0 : i32
    return %arg0, %c0_i32 : i32, i32
  }
  func.func @transform_1(%arg0: i32) -> (i32, i32) {
    %c0_i32 = arith.constant 0 : i32
    %c0_i32_0 = arith.constant 0 : i32
    return %arg0, %c0_i32 : i32, i32
  }
  func.func @transform_2(%arg0: i32) -> (i32, i32) {
    %c0_i32 = arith.constant 0 : i32
    %c0_i32_0 = arith.constant 0 : i32
    %c0_i32_1 = arith.constant 0 : i32
    return %c0_i32, %c0_i32_0 : i32, i32
  }
  func.func @transform_3(%arg0: i32) -> (i32, i32) {
    %c0_i32 = arith.constant 0 : i32
    %c0_i32_0 = arith.constant 0 : i32
    %c0_i32_1 = arith.constant 0 : i32
    return %c0_i32, %c0_i32_0 : i32, i32
  }
  func.func @transform_4(%arg0: i32) -> (i32, i32) {
    %c0_i32 = arith.constant 0 : i32
    %c0_i32_0 = arith.constant 0 : i32
    %c0_i32_1 = arith.constant 0 : i32
    return %c0_i32, %c0_i32_0 : i32, i32
  }
}

</mosaic_0001>

<bundles_post_ra>
// kernel: tpu_custom_call.1
= control target key start
LH: loop header
LB: loop body
LE: loop exit
PB: predicated region body
PF: predicated region fallthrough
CT: control target
= control target key end

     0   :  { %10 = vsyncpa [#allocation3], 0  ;;  %s360_s0 = inlined_call_operand.hbm [shape: f32[16,128], index: 0, kind: input, shape index: {}]   ;;  %s361_s1 = inlined_call_operand.hbm [shape: f32[16,128], index: 1, kind: input, shape index: {}]   ;;  %s362_s2 = inlined_call_operand.hbm [shape: f32[8,128], index: 2, kind: output, shape index: {0}]   ;;  %s363_s3 = inlined_call_operand.hbm [shape: f32[8,128], index: 3, kind: output, shape index: {1}]   ;;  %s364_s4 = inlined_call_operand.hbm [shape: f32[8,128], index: 4, kind: output, shape index: {2}]  }
   0x1   :  { %11 = vsyncpa [#allocation6], 0 }
   0x2   :  { %12 = vsyncpa [#allocation4], 0 }
   0x3   :  { %13 = vsyncpa [#allocation9], 0  ;;  %s254_s15 = smov [#allocation2]   ;;  %s136_s19 = scalar_lea.hbm %s360_s0, 256 }
   0x4   :  { %s19_s16 = sshll.u32 %s254_s15, 4  ;;  %p137_p0 = scmp.ne.s32.totalorder %s360_s0, %s136_s19  ;;  %s20_s16 = int_to_ptr.vmem [resolvable:$true] %s19_s16 }
   0x5   :  { %p140_p1 = scmp.lt.u32.totalorder %s136_s19, %s360_s0 }
   0x7   :  { %p142_p2 = pnand %p140_p1, %p137_p0 }
   0x9   :  { %145 = shalt.err (!%p142_p2)
}
   0xa   :  { %s146_s24 = scalar_lea.vmem %s20_s16, 256  ;;  %p151_p4 = scmp.lt.s32.totalorder %s20_s16, %s20_s16 }
   0xb   :  { %p147_p3 = scmp.ne.s32.totalorder %s20_s16, %s146_s24  ;;  %p152_p5 = scmp.lt.s32.totalorder %s146_s24, %s146_s24 }
   0xd   :  { %p153_p6 = por %p152_p5, %p151_p4 }
   0xf   :  { %p154_p7 = pnand %p153_p6, %p147_p3 }
  0x11   :  { %157 = shalt.err (!%p154_p7)
}
  0x12   :  { %s255_s25 = smov 128   ;;  %s256_s26 = smov 8  }
  0x13   :  { %25 = dma.hbm_to_vmem [thread:$0]  %s360_s0, 256, %s20_s16, [#allocation3], %s255_s25, %s255_s25, %s256_s26  }
  0x14   :  { %s257_s29 = smov [#allocation5]   ;;  %s158_s7 = scalar_lea.hbm %s361_s1, 256 }
  0x15   :  { %s31_s30 = sshll.u32 %s257_s29, 4  ;;  %p159_p8 = scmp.ne.s32.totalorder %s361_s1, %s158_s7  ;;  %s32_s30 = int_to_ptr.vmem [resolvable:$true] %s31_s30 }
  0x16   :  { %p162_p9 = scmp.lt.u32.totalorder %s158_s7, %s361_s1 }
  0x18   :  { %p164_p10 = pnand %p162_p9, %p159_p8 }
  0x1a   :  { %167 = shalt.err (!%p164_p10)
}
  0x1b   :  { %s168_s12 = scalar_lea.vmem %s32_s30, 256  ;;  %p173_p12 = scmp.lt.s32.totalorder %s32_s30, %s32_s30 }
  0x1c   :  { %p169_p11 = scmp.ne.s32.totalorder %s32_s30, %s168_s12  ;;  %p174_p13 = scmp.lt.s32.totalorder %s168_s12, %s168_s12 }
  0x1e   :  { %p175_p0 = por %p174_p13, %p173_p12 }
  0x20   :  { %p176_p1 = pnand %p175_p0, %p169_p11 }
  0x22   :  { %179 = shalt.err (!%p176_p1)
}
  0x23   :  { %37 = dma.hbm_to_vmem [thread:$0]  %s361_s1, 256, %s32_s30, [#allocation6], %s255_s25, %s255_s25, %s256_s26  }
  0x24   :  { %246 = dma.done.wait [#allocation3], 256  }
  0x25   :  { %247 = vsyncadd [#allocation3], 4294967040 }
  0x26   :  { %248 = dma.done.wait [#allocation6], 256  }
  0x27   :  { %249 = vsyncadd [#allocation6], 4294967040  ;;  %v51_v0 = vld [vmem:[#allocation2] sm:$0xff]  ;;  %v52_v1 = vld [vmem:[#allocation2 + $0x8] sm:$0xff]  ;;  %s258_s1 = smov [#allocation8]   ;;  %s259_s15 = smov [#allocation10]  }
  0x28   :  { %v53_v2 = vld [vmem:[#allocation5] sm:$0xff]  ;;  %v54_v3 = vld [vmem:[#allocation5 + $0x8] sm:$0xff]  ;;  %v55_v4 = vmul.f32 0.5, %v51_v0  ;;  %v56_v5 = vmul.f32 0.5, %v52_v1  ;;  %s97_s14 = sshll.u32 %s258_s1, 4  ;;  %s107_s16 = sshll.u32 %s259_s15, 4  ;;  %s98_s14 = int_to_ptr.vmem [resolvable:$true] %s97_s14  ;;  %s310_s16 = int_to_ptr.vmem [resolvable:$true] %s107_s16 }
  0x29   :  { %v78_v6 = vadd.f32 %v54_v3, %v53_v2  ;;  %s260_s17 = smov [#allocation7]   ;;  %s180_s19 = scalar_lea.vmem %s98_s14, 128 }
  0x2a   :  { %132 = vtanh.f32 %v55_v4  ;;  %s87_s18 = sshll.u32 %s260_s17, 4  ;;  %p181_p2 = scmp.ne.s32.totalorder %s98_s14, %s180_s19  ;;  %s312_s18 = int_to_ptr.vmem [resolvable:$true] %s87_s18 }
  0x2b   :  { %134 = vtanh.f32 %v56_v5  ;;  %80 = vst [vmem:[#allocation10] sm:$0xff] %v78_v6  ;;  %p185_p3 = scmp.lt.s32.totalorder %s98_s14, %s98_s14  ;;  %p186_p4 = scmp.lt.s32.totalorder %s180_s19, %s180_s19 }
  0x2d   :  { %p187_p5 = por %p186_p4, %p185_p3 }
  0x2f   :  { %p188_p6 = pnand %p187_p5, %p181_p2 }
  0x34   :  { %v133_v7 = vpop.eup %132 }
  0x35   :  { %v135_v8 = vpop.eup %134  ;;  %v59_v9 = vmul.f32 0.5, %v133_v7 }
  0x36   :  { %v60_v10 = vmul.f32 0.5, %v135_v8 }
  0x37   :  { %v61_v11 = vadd.f32 0.5, %v59_v9 }
  0x38   :  { %v62_v12 = vadd.f32 0.5, %v60_v10 }
  0x39   :  { %v63_v13 = vsub.f32 %v61_v11, %v53_v2 }
  0x3a   :  { %v64_v14 = vsub.f32 %v62_v12, %v54_v3 }
  0x3b   :  { %v65_v15 = vmul.f32 %v63_v13, %v63_v13 }
  0x3c   :  { %v66_v16 = vmul.f32 %v64_v14, %v64_v14 }
  0x3d   :  { %v68_v17 = vmul.f32 %v65_v15, %v53_v2 }
  0x3e   :  { %v74_v18 = vadd.f32 %v66_v16, %v65_v15  ;;  %v69_v19 = vmul.f32 %v66_v16, %v54_v3 }
  0x40   :  { %v70_v20 = vadd.f32 %v69_v19, %v68_v17  ;;  %76 = vst [vmem:[#allocation8] sm:$0xff] %v74_v18 }
  0x41   :  { %191 = shalt.err (!%p188_p6)
}
  0x42   :  { %s192_s22 = scalar_lea.hbm %s363_s3, 128 }
  0x43   :  { %p193_p7 = scmp.ne.s32.totalorder %s363_s3, %s192_s22  ;;  %p196_p8 = scmp.lt.u32.totalorder %s192_s22, %s363_s3 }
  0x45   :  { %p198_p9 = pnand %p196_p8, %p193_p7 }
  0x47   :  { %201 = shalt.err (!%p198_p9)
}
  0x48   :  { %100 = dma.vmem_to_hbm [thread:$0]  %s98_s14, 128, %s363_s3, [#allocation9]   ;;  %72 = vst [vmem:[#allocation7] sm:$0xff] %v70_v20 }
  0x49   :  { %s202_s29 = scalar_lea.vmem %s310_s16, 128  ;;  %p207_p11 = scmp.lt.s32.totalorder %s310_s16, %s310_s16 }
  0x4a   :  { %p203_p10 = scmp.ne.s32.totalorder %s310_s16, %s202_s29  ;;  %p208_p12 = scmp.lt.s32.totalorder %s202_s29, %s202_s29 }
  0x4c   :  { %p209_p13 = por %p208_p12, %p207_p11 }
  0x4e   :  { %p210_p0 = pnand %p209_p13, %p203_p10 }
  0x50   :  { %213 = shalt.err (!%p210_p0)
}
  0x51   :  { %s214_s6 = scalar_lea.hbm %s364_s4, 128 }
  0x52   :  { %p215_p1 = scmp.ne.s32.totalorder %s364_s4, %s214_s6  ;;  %p218_p2 = scmp.lt.u32.totalorder %s214_s6, %s364_s4 }
  0x54   :  { %p220_p3 = pnand %p218_p2, %p215_p1 }
  0x56   :  { %223 = shalt.err (!%p220_p3)
}
  0x57   :  { %110 = dma.vmem_to_hbm [thread:$0]  %s310_s16, 128, %s364_s4, [#allocation9]  }
  0x58   :  { %s224_s12 = scalar_lea.vmem %s312_s18, 128  ;;  %p229_p5 = scmp.lt.s32.totalorder %s312_s18, %s312_s18 }
  0x59   :  { %p225_p4 = scmp.ne.s32.totalorder %s312_s18, %s224_s12  ;;  %p230_p6 = scmp.lt.s32.totalorder %s224_s12, %s224_s12 }
  0x5b   :  { %p231_p7 = por %p230_p6, %p229_p5 }
  0x5d   :  { %p232_p8 = pnand %p231_p7, %p225_p4 }
  0x5f   :  { %235 = shalt.err (!%p232_p8)
}
  0x60   :  { %s236_s1 = scalar_lea.hbm %s362_s2, 128 }
  0x61   :  { %p237_p9 = scmp.ne.s32.totalorder %s362_s2, %s236_s1  ;;  %p240_p10 = scmp.lt.u32.totalorder %s236_s1, %s362_s2 }
  0x63   :  { %p242_p11 = pnand %p240_p10, %p237_p9 }
  0x65   :  { %245 = shalt.err (!%p242_p11)
}
  0x66   :  { %90 = dma.vmem_to_hbm [thread:$0]  %s312_s18, 128, %s362_s2, [#allocation4]  }
  0x67   :  { %250 = dma.done.wait [#allocation4], 128  }
  0x68   :  { %251 = vsyncadd [#allocation4], 4294967168 }
  0x69   :  { %252 = dma.done.wait [#allocation9], 256  }
  0x6a   :  { %253 = vsyncadd [#allocation9], 4294967040 }
  0x6b   :  { %120 = vsyncpa [#allocation3], 1 }
  0x6c   :  { %121 = vsyncpa [#allocation6], 1 }
  0x6d   :  { %122 = vsyncpa [#allocation4], 1 }
  0x6e   :  { %123 = vsyncpa [#allocation9], 1 }

</bundles_post_ra>
